<compile_context>
chip_gen: v6e
topology: v6e:2x2x1
jax: 0.10.0
libtpu: 0.0.40
codegen_flags: <defaults>
</compile_context>

<pallas_src>
import jax
import jax.numpy as jnp
import numpy as np
from jax.experimental import pallas as pl
from jax.experimental.pallas import tpu as pltpu

IN_DIM = 784          # 28*28
H1 = 256
H2 = 128


def _round_up(n, m):
    return ((n + m - 1) // m) * m


def _ae_kernel(x_ref,
               w1_ref, b1_ref,
               w2_ref, b2_ref,
               w3_ref, b3_ref,
               w4_ref, b4_ref,
               o_ref):
    """Fused 4x (Linear + ReLU) forward for one batch tile, all in VMEM.

    x arrives f32 and is cast to bf16 in-kernel; weights are bf16 (MXU inputs);
    accumulation, bias add and ReLU run in f32.
    """
    x = x_ref[...].astype(jnp.bfloat16)                       # (tile, 784)

    h = jnp.dot(x, w1_ref[...], preferred_element_type=jnp.float32) + b1_ref[...]
    h = jnp.maximum(h, 0.0).astype(jnp.bfloat16)              # (tile, 256)

    h = jnp.dot(h, w2_ref[...], preferred_element_type=jnp.float32) + b2_ref[...]
    h = jnp.maximum(h, 0.0).astype(jnp.bfloat16)              # (tile, 128)

    h = jnp.dot(h, w3_ref[...], preferred_element_type=jnp.float32) + b3_ref[...]
    h = jnp.maximum(h, 0.0).astype(jnp.bfloat16)              # (tile, 256)

    h = jnp.dot(h, w4_ref[...], preferred_element_type=jnp.float32) + b4_ref[...]
    o_ref[...] = jnp.maximum(h, 0.0)                          # (tile, 784) f32


def prepare_params(params):
    """One-time parameter glue: transpose PyTorch-convention (out,in) weights to
    (in,out), cast to bf16, reshape biases to (1,H) f32.  Hoisted out of the
    forward path so serving-style calls don't pay the transpose/cast every time."""
    bf16 = jnp.bfloat16
    f32 = jnp.float32
    return {
        "w1": params["enc1_w"].T.astype(bf16),                 # (784, 256)
        "w2": params["enc2_w"].T.astype(bf16),                 # (256, 128)
        "w3": params["dec4_w"].T.astype(bf16),                 # (128, 256)
        "w4": params["dec5_w"].T.astype(bf16),                 # (256, 784)
        "b1": params["enc1_b"].astype(f32).reshape(1, H1),
        "b2": params["enc2_b"].astype(f32).reshape(1, H2),
        "b3": params["dec4_b"].astype(f32).reshape(1, H1),
        "b4": params["dec5_b"].astype(f32).reshape(1, IN_DIM),
    }


def fc_autoencoder_forward(x, prepared, *, batch_tile=512):
    """x: (B, 784) float32.  prepared: output of prepare_params().

    Returns (B, 784) float32 matching F.relu(dec5(relu(dec4(relu(enc2(relu(enc1(x))))))))
    up to bf16 matmul-input precision.
    """
    B, D = x.shape
    assert D == IN_DIM

    # Sublane-aligned batch tile; no divisibility requirement on B (Pallas masks
    # the ragged last block; rows are independent so OOB rows can't contaminate).
    tile = _round_up(min(batch_tile, B), 8)
    grid = pl.cdiv(B, tile)

    full = lambda i: (0, 0)   # weights/biases VMEM-resident for every batch tile

    out = pl.pallas_call(
        _ae_kernel,
        out_shape=jax.ShapeDtypeStruct((B, IN_DIM), jnp.float32),
        grid_spec=pltpu.PrefetchScalarGridSpec(
            num_scalar_prefetch=0,
            grid=(grid,),
            in_specs=[
                pl.BlockSpec((tile, IN_DIM), lambda i: (i, 0)),      # x tile (f32)
                pl.BlockSpec((IN_DIM, H1), full), pl.BlockSpec((1, H1), full),
                pl.BlockSpec((H1, H2), full),     pl.BlockSpec((1, H2), full),
                pl.BlockSpec((H2, H1), full),     pl.BlockSpec((1, H1), full),
                pl.BlockSpec((H1, IN_DIM), full), pl.BlockSpec((1, IN_DIM), full),
            ],
            out_specs=pl.BlockSpec((tile, IN_DIM), lambda i: (i, 0)),
        ),
        compiler_params=pltpu.CompilerParams(
            dimension_semantics=("parallel",),    # megacore-shardable on v7x
            vmem_limit_bytes=32 * 1024 * 1024,    # headroom for tile>=512 on v5e
        ),
    )(x,
      prepared["w1"], prepared["b1"],
      prepared["w2"], prepared["b2"],
      prepared["w3"], prepared["b3"],
      prepared["w4"], prepared["b4"])

    return out


def init_params(key):
    """Deterministic init mirroring nn.Linear shapes (weight: (out,in), bias: (out,))."""
    dims = [("enc1", IN_DIM, H1), ("enc2", H1, H2),
            ("dec4", H2, H1), ("dec5", H1, IN_DIM)]
    params = {}
    for name, fan_in, fan_out in dims:
        key, kw, kb = jax.random.split(key, 3)
        bound = 1.0 / np.sqrt(fan_in)
        params[f"{name}_w"] = jax.random.uniform(
            kw, (fan_out, fan_in), jnp.float32, minval=-bound, maxval=bound)
        params[f"{name}_b"] = jax.random.uniform(
            kb, (fan_out,), jnp.float32, minval=-bound, maxval=bound)
    return params


def _reference_forward(x, params):
    h = jax.nn.relu(x @ params["enc1_w"].T + params["enc1_b"])
    h = jax.nn.relu(h @ params["enc2_w"].T + params["enc2_b"])
    h = jax.nn.relu(h @ params["dec4_w"].T + params["dec4_b"])
    h = jax.nn.relu(h @ params["dec5_w"].T + params["dec5_b"])
    return h


if __name__ == "__main__":
    key = jax.random.PRNGKey(0)
    key, kx = jax.random.split(key)
    params = init_params(key)
    prepared = prepare_params(params)

    # Small demo: B=24 with batch_tile=16 exercises a 2-step grid including a
    # ragged (masked) last batch tile and the unpadded 784-wide I/O path.
    B = 24
    x = jax.random.normal(kx, (B, IN_DIM), jnp.float32)

    out = fc_autoencoder_forward(x, prepared, batch_tile=16)
    out = jax.block_until_ready(out)

    ref = _reference_forward(x, params)
    # bf16 matmul inputs (f32 accumulation) => loosened tolerance vs f32 reference.
    np.testing.assert_allclose(np.asarray(out), np.asarray(ref),
                               rtol=2e-2, atol=2e-2)
    print("KERNEL_OK")
</pallas_src>

<mosaic_0001>
module attributes {stable_mosaic.version = 11 : i64} {
  func.func @_ae_kernel(%arg0: i32, %arg1: memref<16x784xf32, #tpu.memory_space<vmem>>, %arg2: memref<784x256xbf16, #tpu.memory_space<vmem>>, %arg3: memref<1x256xf32, #tpu.memory_space<vmem>>, %arg4: memref<256x128xbf16, #tpu.memory_space<vmem>>, %arg5: memref<1x128xf32, #tpu.memory_space<vmem>>, %arg6: memref<128x256xbf16, #tpu.memory_space<vmem>>, %arg7: memref<1x256xf32, #tpu.memory_space<vmem>>, %arg8: memref<256x784xbf16, #tpu.memory_space<vmem>>, %arg9: memref<1x784xf32, #tpu.memory_space<vmem>>, %arg10: memref<16x784xf32, #tpu.memory_space<vmem>>) attributes {dimension_semantics = [#tpu.dimension_semantics<parallel>], iteration_bounds = array<i64: 2>, scalar_prefetch = 0 : i64, scratch_operands = 0 : i64, tpu.core_type = #tpu.core_type<tc>, window_params = [{transform_indices = @transform_0, window_bounds = array<i64: 16, 784>}, {pipeline_mode = #tpu.pipeline_mode<synchronous>, transform_indices = @transform_1, window_bounds = array<i64: 784, 256>}, {pipeline_mode = #tpu.pipeline_mode<synchronous>, transform_indices = @transform_2, window_bounds = array<i64: 1, 256>}, {pipeline_mode = #tpu.pipeline_mode<synchronous>, transform_indices = @transform_3, window_bounds = array<i64: 256, 128>}, {pipeline_mode = #tpu.pipeline_mode<synchronous>, transform_indices = @transform_4, window_bounds = array<i64: 1, 128>}, {pipeline_mode = #tpu.pipeline_mode<synchronous>, transform_indices = @transform_5, window_bounds = array<i64: 128, 256>}, {pipeline_mode = #tpu.pipeline_mode<synchronous>, transform_indices = @transform_6, window_bounds = array<i64: 1, 256>}, {pipeline_mode = #tpu.pipeline_mode<synchronous>, transform_indices = @transform_7, window_bounds = array<i64: 256, 784>}, {pipeline_mode = #tpu.pipeline_mode<synchronous>, transform_indices = @transform_8, window_bounds = array<i64: 1, 784>}, {transform_indices = @transform_9, window_bounds = array<i64: 16, 784>}]} {
    %c0 = arith.constant 0 : index
    %c0_0 = arith.constant 0 : index
    %0 = vector.load %arg1[%c0, %c0_0] : memref<16x784xf32, #tpu.memory_space<vmem>>, vector<16x784xf32>
    %1 = arith.truncf %0 : vector<16x784xf32> to vector<16x784xbf16>
    %c0_1 = arith.constant 0 : index
    %c0_2 = arith.constant 0 : index
    %2 = vector.load %arg2[%c0_1, %c0_2] : memref<784x256xbf16, #tpu.memory_space<vmem>>, vector<784x256xbf16>
    %cst = arith.constant dense<0.000000e+00> : vector<16x256xf32>
    %3 = tpu.matmul %1, %2, %cst {dimension_numbers = #tpu.dot_dimension_numbers<[1], [0], [0], [1], [0, 0, 1, 1], [], []>} : vector<16x784xbf16>, vector<784x256xbf16>, vector<16x256xf32> -> vector<16x256xf32>
    %c0_3 = arith.constant 0 : index
    %c0_4 = arith.constant 0 : index
    %4 = vector.load %arg3[%c0_3, %c0_4] : memref<1x256xf32, #tpu.memory_space<vmem>>, vector<1x256xf32>
    %5 = vector.broadcast %4 : vector<1x256xf32> to vector<16x256xf32>
    %6 = arith.addf %3, %5 : vector<16x256xf32>
    %cst_5 = arith.constant 0.000000e+00 : f32
    %7 = vector.broadcast %cst_5 : f32 to vector<16x256xf32>
    %8 = arith.maximumf %6, %7 : vector<16x256xf32>
    %9 = arith.truncf %8 : vector<16x256xf32> to vector<16x256xbf16>
    %c0_6 = arith.constant 0 : index
    %c0_7 = arith.constant 0 : index
    %10 = vector.load %arg4[%c0_6, %c0_7] : memref<256x128xbf16, #tpu.memory_space<vmem>>, vector<256x128xbf16>
    %cst_8 = arith.constant dense<0.000000e+00> : vector<16x128xf32>
    %11 = tpu.matmul %9, %10, %cst_8 {dimension_numbers = #tpu.dot_dimension_numbers<[1], [0], [0], [1], [0, 0, 1, 1], [], []>} : vector<16x256xbf16>, vector<256x128xbf16>, vector<16x128xf32> -> vector<16x128xf32>
    %c0_9 = arith.constant 0 : index
    %c0_10 = arith.constant 0 : index
    %12 = vector.load %arg5[%c0_9, %c0_10] : memref<1x128xf32, #tpu.memory_space<vmem>>, vector<1x128xf32>
    %13 = vector.broadcast %12 : vector<1x128xf32> to vector<16x128xf32>
    %14 = arith.addf %11, %13 : vector<16x128xf32>
    %cst_11 = arith.constant 0.000000e+00 : f32
    %15 = vector.broadcast %cst_11 : f32 to vector<16x128xf32>
    %16 = arith.maximumf %14, %15 : vector<16x128xf32>
    %17 = arith.truncf %16 : vector<16x128xf32> to vector<16x128xbf16>
    %c0_12 = arith.constant 0 : index
    %c0_13 = arith.constant 0 : index
    %18 = vector.load %arg6[%c0_12, %c0_13] : memref<128x256xbf16, #tpu.memory_space<vmem>>, vector<128x256xbf16>
    %cst_14 = arith.constant dense<0.000000e+00> : vector<16x256xf32>
    %19 = tpu.matmul %17, %18, %cst_14 {dimension_numbers = #tpu.dot_dimension_numbers<[1], [0], [0], [1], [0, 0, 1, 1], [], []>} : vector<16x128xbf16>, vector<128x256xbf16>, vector<16x256xf32> -> vector<16x256xf32>
    %c0_15 = arith.constant 0 : index
    %c0_16 = arith.constant 0 : index
    %20 = vector.load %arg7[%c0_15, %c0_16] : memref<1x256xf32, #tpu.memory_space<vmem>>, vector<1x256xf32>
    %21 = vector.broadcast %20 : vector<1x256xf32> to vector<16x256xf32>
    %22 = arith.addf %19, %21 : vector<16x256xf32>
    %cst_17 = arith.constant 0.000000e+00 : f32
    %23 = vector.broadcast %cst_17 : f32 to vector<16x256xf32>
    %24 = arith.maximumf %22, %23 : vector<16x256xf32>
    %25 = arith.truncf %24 : vector<16x256xf32> to vector<16x256xbf16>
    %c0_18 = arith.constant 0 : index
    %c0_19 = arith.constant 0 : index
    %26 = vector.load %arg8[%c0_18, %c0_19] : memref<256x784xbf16, #tpu.memory_space<vmem>>, vector<256x784xbf16>
    %cst_20 = arith.constant dense<0.000000e+00> : vector<16x784xf32>
    %27 = tpu.matmul %25, %26, %cst_20 {dimension_numbers = #tpu.dot_dimension_numbers<[1], [0], [0], [1], [0, 0, 1, 1], [], []>} : vector<16x256xbf16>, vector<256x784xbf16>, vector<16x784xf32> -> vector<16x784xf32>
    %c0_21 = arith.constant 0 : index
    %c0_22 = arith.constant 0 : index
    %28 = vector.load %arg9[%c0_21, %c0_22] : memref<1x784xf32, #tpu.memory_space<vmem>>, vector<1x784xf32>
    %29 = vector.broadcast %28 : vector<1x784xf32> to vector<16x784xf32>
    %30 = arith.addf %27, %29 : vector<16x784xf32>
    %cst_23 = arith.constant 0.000000e+00 : f32
    %31 = vector.broadcast %cst_23 : f32 to vector<16x784xf32>
    %32 = arith.maximumf %30, %31 : vector<16x784xf32>
    %c0_24 = arith.constant 0 : index
    %c0_25 = arith.constant 0 : index
    %33 = vector.load %arg10[%c0_24, %c0_25] : memref<16x784xf32, #tpu.memory_space<vmem>>, vector<16x784xf32>
    tpu.vector_store %arg10[%c0_24, %c0_25], %32 {strides = array<i32>} : memref<16x784xf32, #tpu.memory_space<vmem>>, vector<16x784xf32>,
    return
  }
  func.func @transform_0(%arg0: i32) -> (i32, i32) {
    %c0_i32 = arith.constant 0 : i32
    %c0_i32_0 = arith.constant 0 : i32
    return %arg0, %c0_i32 : i32, i32
  }
  func.func @transform_1(%arg0: i32) -> (i32, i32) {
    %c0_i32 = arith.constant 0 : i32
    %c0_i32_0 = arith.constant 0 : i32
    %c0_i32_1 = arith.constant 0 : i32
    return %c0_i32, %c0_i32_0 : i32, i32
  }
  func.func @transform_2(%arg0: i32) -> (i32, i32) {
    %c0_i32 = arith.constant 0 : i32
    %c0_i32_0 = arith.constant 0 : i32
    %c0_i32_1 = arith.constant 0 : i32
    return %c0_i32, %c0_i32_0 : i32, i32
  }
  func.func @transform_3(%arg0: i32) -> (i32, i32) {
    %c0_i32 = arith.constant 0 : i32
    %c0_i32_0 = arith.constant 0 : i32
    %c0_i32_1 = arith.constant 0 : i32
    return %c0_i32, %c0_i32_0 : i32, i32
  }
  func.func @transform_4(%arg0: i32) -> (i32, i32) {
    %c0_i32 = arith.constant 0 : i32
    %c0_i32_0 = arith.constant 0 : i32
    %c0_i32_1 = arith.constant 0 : i32
    return %c0_i32, %c0_i32_0 : i32, i32
  }
  func.func @transform_5(%arg0: i32) -> (i32, i32) {
    %c0_i32 = arith.constant 0 : i32
    %c0_i32_0 = arith.constant 0 : i32
    %c0_i32_1 = arith.constant 0 : i32
    return %c0_i32, %c0_i32_0 : i32, i32
  }
  func.func @transform_6(%arg0: i32) -> (i32, i32) {
    %c0_i32 = arith.constant 0 : i32
    %c0_i32_0 = arith.constant 0 : i32
    %c0_i32_1 = arith.constant 0 : i32
    return %c0_i32, %c0_i32_0 : i32, i32
  }
  func.func @transform_7(%arg0: i32) -> (i32, i32) {
    %c0_i32 = arith.constant 0 : i32
    %c0_i32_0 = arith.constant 0 : i32
    %c0_i32_1 = arith.constant 0 : i32
    return %c0_i32, %c0_i32_0 : i32, i32
  }
  func.func @transform_8(%arg0: i32) -> (i32, i32) {
    %c0_i32 = arith.constant 0 : i32
    %c0_i32_0 = arith.constant 0 : i32
    %c0_i32_1 = arith.constant 0 : i32
    return %c0_i32, %c0_i32_0 : i32, i32
  }
  func.func @transform_9(%arg0: i32) -> (i32, i32) {
    %c0_i32 = arith.constant 0 : i32
    %c0_i32_0 = arith.constant 0 : i32
    return %arg0, %c0_i32 : i32, i32
  }
}

</mosaic_0001>

<bundles_post_ra>
// kernel: tpu_custom_call.1
= control target key start
LH: loop header
LB: loop body
LE: loop exit
PB: predicated region body
PF: predicated region fallthrough
CT: control target
= control target key end

     0   :  { %14 = vsyncpa [#allocation3], 0  ;;  %s4261_s0 = inlined_call_operand.vmem [shape: f32[24,784], index: 0, kind: input, shape index: {}]   ;;  %s4262_s1 = inlined_call_operand.vmem [shape: bf16[784,256], index: 1, kind: input, shape index: {}]   ;;  %s4263_s2 = inlined_call_operand.vmem [shape: f32[1,256], index: 2, kind: input, shape index: {}]   ;;  %s4264_s3 = inlined_call_operand.vmem [shape: bf16[256,128], index: 3, kind: input, shape index: {}]   ;;  %s4265_s4 = inlined_call_operand.vmem [shape: f32[1,128], index: 4, kind: input, shape index: {}]   ;;  %s4266_s5 = inlined_call_operand.vmem [shape: bf16[128,256], index: 5, kind: input, shape index: {}]   ;;  %s4267_s6 = inlined_call_operand.vmem [shape: f32[1,256], index: 6, kind: input, shape index: {}]   ;;  %s4268_s7 = inlined_call_operand.vmem [shape: bf16[256,784], index: 7, kind: input, shape index: {}]   ;;  %s4269_s8 = inlined_call_operand.vmem [shape: f32[1,784], index: 8, kind: input, shape index: {}]   ;;  %s4270_s9 = inlined_call_operand.hbm [shape: f32[24,784], index: 9, kind: output, shape index: {}]  }
   0x1   :  { %16 = vsyncpa [#allocation3 + $0x1], 0  ;;  %s3340_s30 = smov 0   ;;  %s3342_s10 = smov 0  }
   0x2   :  { %s3344_s11 = smov 0   ;;  %s3346_s12 = smov 0  }
   0x3 LB: > { %s3361_s13 = sadd.s32 4294967295, %s3284_s12   ;;  %s2530_s14 = sadd.s32 4294967294, %s3284_s12   ;;  %s3284_s12 = sphi %s3346_s12, %s4276_s12   ;;  %s3280_s11 = sphi %s3344_s11, %s4275_s11   ;;  %s3276_s10 = sphi %s3342_s10, %s4274_s10   ;;  %s3272_s30 = sphi %s3340_s30, %s4273_s30  }
   0x4   : > { %s3365_s15 = sadd.s32 1, %s3284_s12   ;;  %s223_s16 = sadd.s32 1, %s3280_s11 }
   0x5   : > { %s220_s17 = ssub.s32 %s3284_s12, %s3365_s15  ;;  %p233_p0 = scmp.ne.s32.totalorder %s3280_s11, %s3276_s10 }
   0x6   : > { %p221_p1 = scmp.eq.s32.totalorder %s220_s17, 0  ;;  %p234_p2 = scmp.eq.s32.totalorder %s3361_s13, 1 }
   0x7   : > { %p239_p3 = scmp.ne.s32.totalorder %s3276_s10, %s3272_s30  ;;  %p240_p4 = scmp.eq.s32.totalorder %s2530_s14, 1 }
   0x8   : > { %s3376_s18 = scalar_select %p221_p1, %s3280_s11, %s223_s16  }
   0x9   : > { %p3378_p5 = por %p234_p2, %p233_p0  ;;  %p3382_p6 = por %p240_p4, %p239_p3 }
   0xa   : > { %p2533_p7 = scmp.ge.s32.totalorder %s3284_s12, 1  ;;  %p302_p8 = scmp.lt.s32.totalorder %s3284_s12, 3 }
   0xc   : > { %p303_p9 = pnand %p2533_p7, %p302_p8 }
   0xd   : > { %s3473_s29 = sshll.u32 (!%p303_p9), %s3361_s13, 1  ;;  %s341_s28 = sand.u32 (!%p303_p9), 1, %s3276_s10  }
   0xe   : > { %306 = sbr.rel (%p303_p9) target bundleno = 1065 (0x429), region = 56  ;;  %p350_p10 = scmp.lt.s32.totalorder (!%p303_p9), %s3473_s29, 2 }
   0xf   : > { %s2833_s22 = smul.u32 (!%p303_p9), 112, %s341_s28  ;;  %s4201_s24 = scalar_lea.sflag (!%p303_p9), [#allocation3], %s341_s28 }
  0x11   : > { %s4178_s23 = scalar_lea.vmem (!%p303_p9), [#allocation2], %s2833_s22 }
  0x13   : > { %v2877_v0 = vld [vmem:[%s4262_s1 + $0x74] ss:$8 sps:$4 sm:$0xff]   ;;  %v2879_v1 = vld [vmem:[%s4262_s1 + $0x70] ss:$8 sps:$4 sm:$0xff]   ;;  %v2883_v4 = vld [vmem:[%s4262_s1 + $0x64] ss:$8 sps:$4 sm:$0xff]  }
  0x14   : > { %993 = vmatprep.subr.bf16.mxu0 %v2877_v0  ;;  %v2880_v2 = vld [vmem:[%s4262_s1 + $0x174] ss:$8 sps:$4 sm:$0xff]   ;;  %v2882_v3 = vld [vmem:[%s4262_s1 + $0x170] ss:$8 sps:$4 sm:$0xff]   ;;  %v2885_v5 = vld [vmem:[%s4262_s1 + $0x60] ss:$8 sps:$4 sm:$0xff]  }
  0x15   : > { %994 = vmatpush1.bf16.msra.mxu0 %v2879_v1  ;;  %1036 = vmatprep.subr.bf16.mxu1 %v2880_v2  ;;  %v2886_v6 = vld [vmem:[%s4262_s1 + $0x164] ss:$8 sps:$4 sm:$0xff]   ;;  %v2888_v7 = vld [vmem:[%s4262_s1 + $0x160] ss:$8 sps:$4 sm:$0xff]   ;;  %v2889_v8 = vld [vmem:[%s4262_s1 + $0x54] ss:$8 sps:$4 sm:$0xff]  }
  0x16   : > { %1037 = vmatpush1.bf16.msra.mxu1 %v2882_v3  ;;  %995 = vmatprep.subr.bf16.mxu0 %v2883_v4  ;;  %v2891_v9 = vld [vmem:[%s4262_s1 + $0x50] ss:$8 sps:$4 sm:$0xff]   ;;  %v2892_v10 = vld [vmem:[%s4262_s1 + $0x154] ss:$8 sps:$4 sm:$0xff]   ;;  %v2895_v11 = vld [vmem:[%s4262_s1 + $0x44] ss:$8 sps:$4 sm:$0xff]  }
  0x17   : > { %1038 = vmatprep.subr.bf16.mxu1 %v2886_v6  ;;  %v2894_v12 = vld [vmem:[%s4262_s1 + $0x150] ss:$8 sps:$4 sm:$0xff]   ;;  %v2898_v13 = vld [vmem:[%s4262_s1 + $0x144] ss:$8 sps:$4 sm:$0xff]   ;;  %v2897_v14 = vld [vmem:[%s4262_s1 + $0x40] ss:$8 sps:$4 sm:$0xff]  }
  0x18   : > { %v2901_v15 = vld [vmem:[%s4262_s1 + $0x34] ss:$8 sps:$4 sm:$0xff]   ;;  %v2900_v16 = vld [vmem:[%s4262_s1 + $0x140] ss:$8 sps:$4 sm:$0xff]   ;;  %v2903_v18 = vld [vmem:[%s4262_s1 + $0x30] ss:$8 sps:$4 sm:$0xff]  }
  0x19   : > { %996 = vmatpush1.bf16.msra.mxu0 %v2885_v5  ;;  %v2904_v17 = vld [vmem:[%s4262_s1 + $0x134] ss:$8 sps:$4 sm:$0xff]   ;;  %v2907_v19 = vld [vmem:[%s4262_s1 + $0x24] ss:$8 sps:$4 sm:$0xff]   ;;  %v2906_v20 = vld [vmem:[%s4262_s1 + $0x130] ss:$8 sps:$4 sm:$0xff]  }
  0x1a   : > { %997 = vmatprep.subr.bf16.mxu0 %v2889_v8  ;;  %1039 = vmatpush1.bf16.msra.mxu1 %v2888_v7  ;;  %v2910_v21 = vld [vmem:[%s4262_s1 + $0x124] ss:$8 sps:$4 sm:$0xff]   ;;  %v2909_v22 = vld [vmem:[%s4262_s1 + $0x20] ss:$8 sps:$4 sm:$0xff]   ;;  %v2913_v23 = vld [vmem:[%s4262_s1 + $0x14] ss:$8 sps:$4 sm:$0xff]  }
  0x1b   : > { %1040 = vmatprep.subr.bf16.mxu1 %v2892_v10  ;;  %v2912_v24 = vld [vmem:[%s4262_s1 + $0x120] ss:$8 sps:$4 sm:$0xff]   ;;  %v2916_v25 = vld [vmem:[%s4262_s1 + $0x114] ss:$8 sps:$4 sm:$0xff]   ;;  %v2915_v26 = vld [vmem:[%s4262_s1 + $0x10] ss:$8 sps:$4 sm:$0xff]  }
  0x1c   : > { %v2919_v27 = vld [vmem:[%s4262_s1 + $0x4] ss:$8 sps:$4 sm:$0xff]   ;;  %v2918_v28 = vld [vmem:[%s4262_s1 + $0x110] ss:$8 sps:$4 sm:$0xff]   ;;  %v2921_v30 = vld [vmem:[%s4262_s1] ss:$8 sps:$4 sm:$0xff]  }
  0x1d   : > { %998 = vmatpush1.bf16.msra.mxu0 %v2891_v9  ;;  %v2922_v29 = vld [vmem:[%s4262_s1 + $0x104] ss:$8 sps:$4 sm:$0xff]   ;;  %v2925_v31 = vld [vmem:[%s4262_s1 + $0xf4] ss:$8 sps:$4 sm:$0xff]   ;;  %v2924_v32 = vld [vmem:[%s4262_s1 + $0x100] ss:$8 sps:$4 sm:$0xff]  }
  0x1e   : > { %999 = vmatprep.subr.bf16.mxu0 %v2895_v11  ;;  %1041 = vmatpush1.bf16.msra.mxu1 %v2894_v12  ;;  %v2928_v33 = vld [vmem:[%s4262_s1 + $0x1f4] ss:$8 sps:$4 sm:$0xff]   ;;  %v2927_v34 = vld [vmem:[%s4262_s1 + $0xf0] ss:$8 sps:$4 sm:$0xff]   ;;  %s351_s21 = scalar_select %p350_p10, %s3473_s29, 2  ;;  %vm989_vm0 = vcmask 130048  }
  0x1f   : > { %1042 = vmatprep.subr.bf16.mxu1 %v2898_v13  ;;  %v2931_v35 = vld [vmem:[%s4262_s1 + $0xe4] ss:$8 sps:$4 sm:$0xff]   ;;  %v2930_v36 = vld [vmem:[%s4262_s1 + $0x1f0] ss:$8 sps:$4 sm:$0xff]   ;;  %v2933_v38 = vld [vmem:[%s4262_s1 + $0xe0] ss:$8 sps:$4 sm:$0xff]  }
  0x20   : > { %v2934_v37 = vld [vmem:[%s4262_s1 + $0x1e4] ss:$8 sps:$4 sm:$0xff]   ;;  %s2834_s16 = smul.u32 56, %s351_s21  ;;  %v2937_v39 = vld [vmem:[%s4262_s1 + $0xd4] ss:$8 sps:$4 sm:$0xff]   ;;  %s2455_s25 = ssub.s32 (%p3378_p5), 3, %s3473_s29 }
  0x21   : > { %1000 = vmatpush1.bf16.msra.mxu0 %v2897_v14  ;;  %v2936_v40 = vld [vmem:[%s4262_s1 + $0x1e0] ss:$8 sps:$4 sm:$0xff]   ;;  %v2940_v41 = vld [vmem:[%s4262_s1 + $0x1d4] ss:$8 sps:$4 sm:$0xff]   ;;  %v2939_v42 = vld [vmem:[%s4262_s1 + $0xd0] ss:$8 sps:$4 sm:$0xff]  }
  0x22   : > { %1001 = vmatprep.subr.bf16.mxu0 %v2901_v15  ;;  %1043 = vmatpush1.bf16.msra.mxu1 %v2900_v16  ;;  %s3525_s17 = scalar_lea.vmem %s4261_s0, %s2834_s16  ;;  %v2943_v43 = vld [vmem:[%s4262_s1 + $0xc4] ss:$8 sps:$4 sm:$0xff]   ;;  %v2942_v44 = vld [vmem:[%s4262_s1 + $0x1d0] ss:$8 sps:$4 sm:$0xff]   ;;  %v2945_v48 = vld [vmem:[%s4262_s1 + $0xc0] ss:$8 sps:$4 sm:$0xff]  }
  0x23   : > { %1044 = vmatprep.subr.bf16.mxu1 %v2904_v17  ;;  %v2946_v45 = vld [vmem:[%s4262_s1 + $0x1c4] ss:$8 sps:$4 sm:$0xff]   ;;  %v2949_v50 = vld [vmem:[%s4262_s1 + $0xb4] ss:$8 sps:$4 sm:$0xff]   ;;  %v2948_v51 = vld [vmem:[%s4262_s1 + $0x1c0] ss:$8 sps:$4 sm:$0xff]  }
  0x24   : > { %v369_v46 = vld [vmem:[%s3525_s17 + $0x8] sm:$0xff]  ;;  %v376_v47 = vld [vmem:[%s3525_s17 + $0x40] sm:$0xff]  ;;  %v371_v52 = vld [vmem:[%s3525_s17 + $0x18] sm:$0xff]  ;;  %p2456_p11 = scmp.lt.s32.totalorder (%p3378_p5), %s2455_s25, 2 }
  0x25   : > { %1002 = vmatpush1.bf16.msra.mxu0 %v2903_v18  ;;  %v383_v49 = vpack.c.bf16 %v376_v47, %v369_v46  ;;  %v378_v53 = vld [vmem:[%s3525_s17 + $0x50] sm:$0xff]  ;;  %v2955_v57 = vld [vmem:[%s4262_s1 + $0xa4] ss:$8 sps:$4 sm:$0xff]   ;;  %v2957_v60 = vld [vmem:[%s4262_s1 + $0xa0] ss:$8 sps:$4 sm:$0xff]  }
  0x26   : > { %1003 = vmatprep.subr.bf16.mxu0 %v2907_v19  ;;  %1045 = vmatpush1.bf16.msra.mxu1 %v2906_v20  ;;  %v2952_v54 = vld [vmem:[%s4262_s1 + $0x1b4] ss:$8 sps:$4 sm:$0xff]   ;;  %v385_v55 = vpack.c.bf16 %v378_v53, %v371_v52  ;;  %v2951_v56 = vld [vmem:[%s4262_s1 + $0xb0] ss:$8 sps:$4 sm:$0xff]   ;;  %v2958_v59 = vld [vmem:[%s4262_s1 + $0x1a4] ss:$8 sps:$4 sm:$0xff]  }
  0x27   : > { %1046 = vmatprep.subr.bf16.mxu1 %v2910_v21  ;;  %1025 = vmatprep.mubr.bf16.mxu0 %v383_v49  ;;  %v2954_v58 = vld [vmem:[%s4262_s1 + $0x1b0] ss:$8 sps:$4 sm:$0xff]   ;;  %v2961_v61 = vld [vmem:[%s4262_s1 + $0x94] ss:$8 sps:$4 sm:$0xff]   ;;  %v2960_v62 = vld [vmem:[%s4262_s1 + $0x1a0] ss:$8 sps:$4 sm:$0xff]  }
  0x28   : > { %1068 = vmatprep.mubr.bf16.mxu1 %v385_v55  ;;  %v2964_v63 = vld [vmem:[%s4262_s1 + $0x194] ss:$8 sps:$4 sm:$0xff]   ;;  %v2963_v0 = vld [vmem:[%s4262_s1 + $0x90] ss:$8 sps:$4 sm:$0xff]   ;;  %v2967_v2 = vld [vmem:[%s4262_s1 + $0x84] ss:$8 sps:$4 sm:$0xff]  }
  0x29   : > { %1004 = vmatpush1.bf16.msra.mxu0 %v2909_v22  ;;  %v2966_v1 = vld [vmem:[%s4262_s1 + $0x190] ss:$8 sps:$4 sm:$0xff]   ;;  %v2969_v3 = vld [vmem:[%s4262_s1 + $0x80] ss:$8 sps:$4 sm:$0xff]   ;;  %v2970_v4 = vld [vmem:[%s4262_s1 + $0x184] ss:$8 sps:$4 sm:$0xff]  }
  0x2a   : > { %1005 = vmatprep.subr.bf16.mxu0 %v2913_v23  ;;  %1047 = vmatpush1.bf16.msra.mxu1 %v2912_v24  ;;  %v368_v5 = vld [vmem:[%s3525_s17] sm:$0xff]  ;;  %v375_v7 = vld [vmem:[%s3525_s17 + $0x38] sm:$0xff]  ;;  %v370_v9 = vld [vmem:[%s3525_s17 + $0x10] sm:$0xff]  ;;  %v3286_v21 = vmov 0  }
  0x2b   : > { %1048 = vmatprep.subr.bf16.mxu1 %v2916_v25  ;;  %v2972_v6 = vld [vmem:[%s4262_s1 + $0x180] ss:$8 sps:$4 sm:$0xff]   ;;  %v2975_v8 = vld [vmem:[%s4262_s1 + $0x274] ss:$8 sps:$4 sm:$0xff]   ;;  %v382_v11 = vpack.c.bf16 %v375_v7, %v368_v5  ;;  %v2973_v12 = vld [vmem:[%s4262_s1 + $0x270] ss:$8 sps:$4 sm:$0xff]  }
  0x2c   : > { %v377_v10 = vld [vmem:[%s3525_s17 + $0x48] sm:$0xff]  ;;  %v2981_v18 = vld [vmem:[%s4262_s1 + $0x254] ss:$8 sps:$4 sm:$0xff]   ;;  %v2979_v20 = vld [vmem:[%s4262_s1 + $0x250] ss:$8 sps:$4 sm:$0xff]  }
  0x2d   : > { %1006 = vmatpush1.bf16.msra.mxu0 %v2915_v26  ;;  %v384_v13 = vpack.c.bf16 %v377_v10, %v370_v9  ;;  %v2978_v14 = vld [vmem:[%s4262_s1 + $0x264] ss:$8 sps:$4 sm:$0xff]   ;;  %v3018_v15 = vld [vmem:[%s4262_s1 + $0x300] ss:$8 sps:$4 sm:$0xff]   ;;  %v374_v22 = vld [vmem:[%s3525_s17 + $0x30] sm:$0xff]  ;;  %v489_v9 = vlaneseq }
  0x2e   : > { %1007 = vmatprep.subr.bf16.mxu0 %v2919_v27  ;;  %1049 = vmatpush1.bf16.msra.mxu1 %v2918_v28  ;;  %v3020_v16 = vld [vmem:[%s4262_s1 + $0x304] ss:$8 sps:$4 sm:$0xff]   ;;  %v2976_v17 = vld [vmem:[%s4262_s1 + $0x260] ss:$8 sps:$4 sm:$0xff]   ;;  %v3009_v46 = vld [vmem:[%s4262_s1 + $0x2b0] ss:$8 sps:$4 sm:$0xff]  }
  0x2f   : > { %1050 = vmatprep.subr.bf16.mxu1 %v2922_v29  ;;  %v373_v19 = vld [vmem:[%s3525_s17 + $0x28] sm:$0xff]  ;;  %v380_v24 = vld [vmem:[%s3525_s17 + $0x60] sm:$0xff]  ;;  %v2987_v29 = vld [vmem:[%s4262_s1 + $0x234] ss:$8 sps:$4 sm:$0xff]  }
  0x30   : > { %v381_v23 = vld [vmem:[%s3525_s17 + $0x68] sm:$0xff]  ;;  %v387_v26 = vpack.c.bf16 %v380_v24, %v373_v19  ;;  %v3017_v49 = vld [vmem:[%s4262_s1 + $0x294] ss:$8 sps:$4 sm:$0xff]   ;;  %v372_v53 = vld [vmem:[%s3525_s17 + $0x20] sm:$0xff] }
  0x31   : > { %1008 = vmatpush1.bf16.msra.mxu0 %v2921_v30  ;;  %v2984_v25 = vld [vmem:[%s4262_s1 + $0x244] ss:$8 sps:$4 sm:$0xff]   ;;  %v388_v27 = vpack.c.bf16 %v381_v23, %v374_v22  ;;  %v2982_v28 = vld [vmem:[%s4262_s1 + $0x240] ss:$8 sps:$4 sm:$0xff]   ;;  %v2985_v30 = vld [vmem:[%s4262_s1 + $0x230] ss:$8 sps:$4 sm:$0xff]  }
  0x32   : > { %1009 = vmatprep.subr.bf16.mxu0 %v2925_v31  ;;  %1051 = vmatpush1.bf16.msra.mxu1 %v2924_v32  ;;  %v2990_v31 = vld [vmem:[%s4262_s1 + $0x224] ss:$8 sps:$4 sm:$0xff]   ;;  %v2988_v32 = vld [vmem:[%s4262_s1 + $0x220] ss:$8 sps:$4 sm:$0xff]  }
  0x33   : > { %1052 = vmatprep.subr.bf16.mxu1 %v2928_v33  ;;  %v2993_v33 = vld [vmem:[%s4262_s1 + $0x214] ss:$8 sps:$4 sm:$0xff]   ;;  %v3014_v47 = vld [vmem:[%s4262_s1 + $0x2a4] ss:$8 sps:$4 sm:$0xff]   ;;  %v3021_v52 = vld [vmem:[%s4262_s1 + $0x280] ss:$8 sps:$4 sm:$0xff]  }
  0x34   : > { %v3037_v5 = vld [vmem:[%s4264_s3 + $0x8] sm:$0xff]   ;;  %v3039_v7 = vld [vmem:[%s4264_s3] sm:$0xff]  }
  0x35   : > { %1010 = vmatpush2.bf16.msra.mxu0 %v2927_v34  ;;  %v2991_v34 = vld [vmem:[%s4262_s1 + $0x210] ss:$8 sps:$4 sm:$0xff]  }
  0x36   : > { %1011 = vmatprep.subr.bf16.mxu0 %v2931_v35  ;;  %1053 = vmatpush2.bf16.msra.mxu1 %v2930_v36  ;;  %v2996_v35 = vld [vmem:[%s4262_s1 + $0x204] ss:$8 sps:$4 sm:$0xff]   ;;  %v2994_v36 = vld [vmem:[%s4262_s1 + $0x200] ss:$8 sps:$4 sm:$0xff]  }
  0x37   : > { %1054 = vmatprep.subr.bf16.mxu1 %v2934_v37  ;;  %v2999_v37 = vld [vmem:[%s4262_s1 + $0x2f4] ss:$8 sps:$4 sm:$0xff]  }
  0x39   : > { %1012 = vmatpush2.bf16.msra.mxu0 %v2933_v38  ;;  %v2997_v38 = vld [vmem:[%s4262_s1 + $0x2f0] ss:$8 sps:$4 sm:$0xff]  }
  0x3a   : > { %1013 = vmatprep.subr.bf16.mxu0 %v2937_v39  ;;  %1055 = vmatpush2.bf16.msra.mxu1 %v2936_v40  ;;  %v3002_v39 = vld [vmem:[%s4262_s1 + $0x2e4] ss:$8 sps:$4 sm:$0xff]   ;;  %v3000_v40 = vld [vmem:[%s4262_s1 + $0x2e0] ss:$8 sps:$4 sm:$0xff]  }
  0x3b   : > { %1056 = vmatprep.subr.bf16.mxu1 %v2940_v41  ;;  %v3005_v41 = vld [vmem:[%s4262_s1 + $0x2d4] ss:$8 sps:$4 sm:$0xff]  }
  0x3d   : > { %1014 = vmatpush2.bf16.msra.mxu0 %v2939_v42  ;;  %v3003_v42 = vld [vmem:[%s4262_s1 + $0x2d0] ss:$8 sps:$4 sm:$0xff]  }
  0x3e   : > { %1015 = vmatprep.subr.bf16.mxu0 %v2943_v43  ;;  %1057 = vmatpush2.bf16.msra.mxu1 %v2942_v44  ;;  %v3008_v43 = vld [vmem:[%s4262_s1 + $0x2c4] ss:$8 sps:$4 sm:$0xff]   ;;  %v3006_v44 = vld [vmem:[%s4262_s1 + $0x2c0] ss:$8 sps:$4 sm:$0xff]  }
  0x3f   : > { %1058 = vmatprep.subr.bf16.mxu1 %v2946_v45  ;;  %v3011_v45 = vld [vmem:[%s4262_s1 + $0x2b4] ss:$8 sps:$4 sm:$0xff]  }
  0x41   : > { %1016 = vmatpush2.bf16.msra.mxu0 %v2945_v48  ;;  %v3012_v48 = vld [vmem:[%s4262_s1 + $0x2a0] ss:$8 sps:$4 sm:$0xff]  }
  0x42   : > { %1017 = vmatprep.subr.bf16.mxu0 %v2949_v50  ;;  %1059 = vmatpush2.bf16.msra.mxu1 %v2948_v51  ;;  %v3015_v50 = vld [vmem:[%s4262_s1 + $0x290] ss:$8 sps:$4 sm:$0xff]   ;;  %v3023_v51 = vld [vmem:[%s4262_s1 + $0x284] ss:$8 sps:$4 sm:$0xff]  }
  0x43   : > { %1060 = vmatprep.subr.bf16.mxu1 %v2952_v54  ;;  %v379_v54 = vld [vmem:[%s3525_s17 + $0x58] sm:$0xff] }
  0x44   : > { %v386_v55 = vpack.c.bf16 %v379_v54, %v372_v53  ;;  %v3040_v54 = vld [vmem:[%s4266_s5 + $0x70] ss:$8 sps:$4 sm:$0xff]  }
  0x45   : > { %1018 = vmatpush2.bf16.msra.mxu0 %v2951_v56  ;;  %v3024_v56 = vld [vmem:[%s4264_s3 + $0x78] sm:$0xff]  }
  0x46   : > { %1019 = vmatprep.subr.bf16.mxu0 %v2955_v57  ;;  %1061 = vmatpush2.bf16.msra.mxu1 %v2954_v58  ;;  %v3025_v57 = vld [vmem:[%s4264_s3 + $0x38] sm:$0xff]   ;;  %v3026_v58 = vld [vmem:[%s4264_s3 + $0x70] sm:$0xff]  }
  0x47   : > { %1062 = vmatprep.subr.bf16.mxu1 %v2958_v59  ;;  %v3027_v59 = vld [vmem:[%s4264_s3 + $0x30] sm:$0xff]  }
  0x49   : > { %1020 = vmatpush2.bf16.msra.mxu0 %v2957_v60  ;;  %v3028_v60 = vld [vmem:[%s4264_s3 + $0x68] sm:$0xff]  }
  0x4a   : > { %1021 = vmatprep.subr.bf16.mxu0 %v2961_v61  ;;  %1063 = vmatpush2.bf16.msra.mxu1 %v2960_v62  ;;  %v3029_v61 = vld [vmem:[%s4264_s3 + $0x28] sm:$0xff]   ;;  %v3030_v62 = vld [vmem:[%s4264_s3 + $0x60] sm:$0xff]  }
  0x4b   : > { %1064 = vmatprep.subr.bf16.mxu1 %v2964_v63  ;;  %v3031_v63 = vld [vmem:[%s4264_s3 + $0x20] sm:$0xff]  }
  0x4d   : > { %1022 = vmatpush2.bf16.msra.mxu0 %v2963_v0  ;;  %v3032_v0 = vld [vmem:[%s4264_s3 + $0x58] sm:$0xff]  }
  0x4e   : > { %1023 = vmatprep.subr.bf16.mxu0 %v2967_v2  ;;  %1065 = vmatpush2.bf16.msra.mxu1 %v2966_v1  ;;  %v3033_v1 = vld [vmem:[%s4264_s3 + $0x18] sm:$0xff]   ;;  %v3034_v2 = vld [vmem:[%s4264_s3 + $0x50] sm:$0xff]  }
  0x4f   : > { %1066 = vmatprep.subr.bf16.mxu1 %v2970_v4  ;;  %v3036_v4 = vld [vmem:[%s4264_s3 + $0x48] sm:$0xff]  }
  0x51   : > { %1024 = vmatpush2.bf16.msra.mxu0 %v2969_v3  ;;  %v3035_v3 = vld [vmem:[%s4264_s3 + $0x10] sm:$0xff]  }
  0x52   : > { %1079 = vmatprep.subr.bf16.mxu0 %v2975_v8  ;;  %1067 = vmatpush2.bf16.msra.mxu1 %v2972_v6  ;;  %v3038_v6 = vld [vmem:[%s4264_s3 + $0x40] sm:$0xff]   ;;  %v3042_v8 = vld [vmem:[%s4266_s5 + $0x74] ss:$8 sps:$4 sm:$0xff]  }
  0x53   : > { %1136 = vmatprep.subr.bf16.mxu1 %v3020_v16 }
  0x54   : > { %1026 = vmatmul.mubr.bf16.vlgmr.msra.gmra.mxu0 %v382_v11  ;;  %v3759_v11 = vshrl.u32 %v489_v9, 7  ;;  %v3070_v9 = vld [vmem:[%s4268_s7 + $0x150] ss:$28 sps:$4 sm:$0xff]  }
  0x55   : > { %1080 = vmatpush1.bf16.msra.mxu0 %v2973_v12  ;;  %1069 = vmatmul.mubr.bf16.vlgmr.msra.gmra.mxu1 %v384_v13 }
  0x56   : > { %1081 = vmatprep.subr.bf16.mxu0 %v2978_v14  ;;  %1154 = vmatprep.mubr.bf16.mxu1 %v3286_v21  ;;  %v3762_v14 = vsub.s32 1, %v3759_v11  ;;  %v3768_v16 = vsub.s32 0, %v3759_v11 }
  0x57   : > { %1137 = vmatpush1.bf16.msra.mxu1 %v3018_v15  ;;  %1111 = vmatprep.mubr.bf16.mxu0 %v387_v26  ;;  %v487_v15 = vld [vmem:[%s4263_s2] sm:$0x3] }
  0x58   : > { %2789 = vmatprep.subr.bf16.mxu1 %v3024_v56  ;;  %v496_v19 = vrot.slane %v487_v15, %v3762_v14  ;;  %v3045_v56 = vld [vmem:[%s4266_s5 + $0x64] ss:$8 sps:$4 sm:$0xff]  }
  0x59   : > { %1082 = vmatpush1.bf16.msra.mxu0 %v2976_v17 }
  0x5a   : > { %1083 = vmatprep.subr.bf16.mxu0 %v2981_v18 }
  0x5d   : > { %1084 = vmatpush1.bf16.msra.mxu0 %v2979_v20  ;;  %2634 = vmatmul.mubr.msk.bf16.vlgmr.msra.gmra.mxu1 %vm989_vm0, %v388_v27  ;;  %v492_v20 = vrot.slane %v487_v15, %v3768_v16  ;;  %v3082_v15 = vld [vmem:[%s4268_s7 + $0xe0] ss:$28 sps:$4 sm:$0xff]  }
  0x5e   : > { %1085 = vmatprep.subr.bf16.mxu0 %v2984_v25  ;;  %2790 = vmatpush3.bf16.msra.mxu1 %v3025_v57  ;;  %v3043_v57 = vld [vmem:[%s4266_s5 + $0x60] ss:$8 sps:$4 sm:$0xff]  }
  0x5f   : > { %2791 = vmatprep.subr.bf16.mxu1 %v3026_v58  ;;  %v3048_v58 = vld [vmem:[%s4266_s5 + $0x54] ss:$8 sps:$4 sm:$0xff]  }
  0x61   : > { %1086 = vmatpush1.bf16.msra.mxu0 %v2982_v28 }
  0x62   : > { %1087 = vmatprep.subr.bf16.mxu0 %v2987_v29  ;;  %2792 = vmatpush3.bf16.msra.mxu1 %v3027_v59  ;;  %v3046_v59 = vld [vmem:[%s4266_s5 + $0x50] ss:$8 sps:$4 sm:$0xff]  }
  0x63   : > { %2793 = vmatprep.subr.bf16.mxu1 %v3028_v60  ;;  %v3051_v60 = vld [vmem:[%s4266_s5 + $0x44] ss:$8 sps:$4 sm:$0xff]  }
  0x65   : > { %1088 = vmatpush1.bf16.msra.mxu0 %v2985_v30 }
  0x66   : > { %1089 = vmatprep.subr.bf16.mxu0 %v2990_v31  ;;  %2794 = vmatpush3.bf16.msra.mxu1 %v3029_v61  ;;  %v3054_v61 = vld [vmem:[%s4266_s5 + $0x34] ss:$8 sps:$4 sm:$0xff]  }
  0x67   : > { %2795 = vmatprep.subr.bf16.mxu1 %v3030_v62  ;;  %v3052_v62 = vld [vmem:[%s4266_s5 + $0x30] ss:$8 sps:$4 sm:$0xff]  }
  0x69   : > { %1090 = vmatpush1.bf16.msra.mxu0 %v2988_v32 }
  0x6a   : > { %1091 = vmatprep.subr.bf16.mxu0 %v2993_v33  ;;  %2796 = vmatpush3.bf16.msra.mxu1 %v3031_v63  ;;  %v3057_v63 = vld [vmem:[%s4266_s5 + $0x24] ss:$8 sps:$4 sm:$0xff]  }
  0x6b   : > { %2797 = vmatprep.subr.bf16.mxu1 %v3032_v0  ;;  %v3055_v0 = vld [vmem:[%s4266_s5 + $0x20] ss:$8 sps:$4 sm:$0xff]  }
  0x6d   : > { %1092 = vmatpush1.bf16.msra.mxu0 %v2991_v34 }
  0x6e   : > { %1093 = vmatprep.subr.bf16.mxu0 %v2996_v35  ;;  %2798 = vmatpush3.bf16.msra.mxu1 %v3033_v1  ;;  %v3060_v1 = vld [vmem:[%s4266_s5 + $0x14] ss:$8 sps:$4 sm:$0xff]  }
  0x6f   : > { %2799 = vmatprep.subr.bf16.mxu1 %v3034_v2  ;;  %v3058_v2 = vld [vmem:[%s4266_s5 + $0x10] ss:$8 sps:$4 sm:$0xff]  }
  0x71   : > { %1094 = vmatpush1.bf16.msra.mxu0 %v2994_v36 }
  0x72   : > { %1095 = vmatprep.subr.bf16.mxu0 %v2999_v37  ;;  %2800 = vmatpush3.bf16.msra.mxu1 %v3035_v3  ;;  %v3063_v3 = vld [vmem:[%s4266_s5 + $0x4] ss:$8 sps:$4 sm:$0xff]  }
  0x73   : > { %2801 = vmatprep.subr.bf16.mxu1 %v3036_v4  ;;  %v3061_v4 = vld [vmem:[%s4266_s5] ss:$8 sps:$4 sm:$0xff]  }
  0x75   : > { %1096 = vmatpush2.bf16.msra.mxu0 %v2997_v38 }
  0x76   : > { %1097 = vmatprep.subr.bf16.mxu0 %v3002_v39  ;;  %2802 = vmatpush3.bf16.msra.mxu1 %v3037_v5  ;;  %v3064_v5 = vld [vmem:[%s4268_s7 + $0x188] ss:$28 sps:$4 sm:$0xff]  }
  0x77   : > { %2803 = vmatprep.subr.bf16.mxu1 %v3038_v6  ;;  %v3066_v6 = vld [vmem:[%s4268_s7 + $0x18c] ss:$28 sps:$4 sm:$0xff]  }
  0x79   : > { %1098 = vmatpush2.bf16.msra.mxu0 %v3000_v40 }
  0x7a   : > { %1099 = vmatprep.subr.bf16.mxu0 %v3005_v41  ;;  %2804 = vmatpush3.bf16.msra.mxu1 %v3039_v7  ;;  %v3069_v7 = vld [vmem:[%s4268_s7 + $0x194] ss:$28 sps:$4 sm:$0xff]  }
  0x7b   : > { %1458 = vmatprep.subr.bf16.mxu1 %v3042_v8  ;;  %v3072_v8 = vld [vmem:[%s4268_s7 + $0x154] ss:$28 sps:$4 sm:$0xff]  }
  0x7d   : > { %1100 = vmatpush2.bf16.msra.mxu0 %v3003_v42 }
  0x7e   : > { %1101 = vmatprep.subr.bf16.mxu0 %v3008_v43 }
  0x81   : > { %1102 = vmatpush2.bf16.msra.mxu0 %v3006_v44 }
  0x82   : > { %1103 = vmatprep.subr.bf16.mxu0 %v3011_v45 }
  0x85   : > { %1104 = vmatpush2.bf16.msra.mxu0 %v3009_v46 }
  0x86   : > { %1105 = vmatprep.subr.bf16.mxu0 %v3014_v47 }
  0x89   : > { %1106 = vmatpush2.bf16.msra.mxu0 %v3012_v48 }
  0x8a   : > { %1107 = vmatprep.subr.bf16.mxu0 %v3017_v49 }
  0x8d   : > { %1108 = vmatpush2.bf16.msra.mxu0 %v3015_v50 }
  0x8e   : > { %1109 = vmatprep.subr.bf16.mxu0 %v3023_v51 }
  0x91   : > { %1110 = vmatpush2.bf16.msra.mxu0 %v3021_v52 }
  0x92   : > { %2248 = vmatprep.subr.bf16.mxu0 %v3066_v6  ;;  %v3141_v6 = vld [vmem:[%s4268_s7 + $0x274] ss:$28 sps:$4 sm:$0xff]  }
  0x94   : > { %1112 = vmatmul.mubr.bf16.vlgmr.msra.gmra.mxu0 %v386_v55 }
  0x95   : > { %2249 = vmatpush1.bf16.msra.mxu0 %v3064_v5  ;;  %v3133_v5 = vld [vmem:[%s4268_s7 + $0x2a8] ss:$28 sps:$4 sm:$0xff]  }
  0x96   : > { %2250 = vmatprep.subr.bf16.mxu0 %v3072_v8  ;;  %v3144_v8 = vld [vmem:[%s4268_s7 + $0x234] ss:$28 sps:$4 sm:$0xff]  }
  0x99   : > { %2251 = vmatpush1.bf16.msra.mxu0 %v3070_v9  ;;  %v3147_v9 = vld [vmem:[%s4268_s7 + $0x23c] ss:$28 sps:$4 sm:$0xff]  }
 0x114   : > { %v1027_v12 = vpop.f32.mrf.mxu0 }
 0x115   : > { %v1070_v10 = vpop.f32.mrf.mxu1  ;;  %v1028_v26 = vadd.f32 %v1027_v12, %v492_v20  ;;  %v3076_v12 = vld [vmem:[%s4268_s7 + $0x118] ss:$28 sps:$4 sm:$0xff]  }
 0x116   : > { %v1029_v17 = vpop.f32.mrf.mxu0 }
 0x117   : > { %v1072_v13 = vpop.f32.mrf.mxu1  ;;  %v1030_v25 = vadd.f32 %v1029_v17, %v496_v19  ;;  %v1071_v33 = vadd.f32 %v1070_v10, %v1028_v26  ;;  %v3078_v10 = vld [vmem:[%s4268_s7 + $0x11c] ss:$28 sps:$4 sm:$0xff]   ;;  %v3090_v17 = vld [vmem:[%s4268_s7 + $0xac] ss:$28 sps:$4 sm:$0xff]  }
 0x118   : > { %v1031_v22 = vpop.f32.mrf.mxu0  ;;  %2252 = vmatprep.subr.bf16.mxu0 %v3078_v10  ;;  %v3114_v26 = vld [vmem:[%s4268_s7 + $0x34c] ss:$28 sps:$4 sm:$0xff]  }
 0x119   : > { %v1074_v18 = vpop.f32.mrf.mxu1  ;;  %v1032_v28 = vadd.f32 %v1031_v22, %v492_v20  ;;  %v1073_v31 = vadd.f32 %v1072_v13, %v1030_v25  ;;  %v3084_v13 = vld [vmem:[%s4268_s7 + $0xe4] ss:$28 sps:$4 sm:$0xff]   ;;  %2253 = vmatpush1.bf16.msra.mxu0 %v3076_v12  ;;  %v3094_v20 = vld [vmem:[%s4268_s7 + $0x70] ss:$28 sps:$4 sm:$0xff]   ;;  %v3102_v22 = vld [vmem:[%s4268_s7 + $0x3c] ss:$28 sps:$4 sm:$0xff]  }
 0x11a   : > { %v1033_v27 = vpop.f32.mrf.mxu0  ;;  %2254 = vmatprep.subr.bf16.mxu0 %v3084_v13  ;;  %v3106_v25 = vld [vmem:[%s4268_s7] ss:$28 sps:$4 sm:$0xff]   ;;  %v3142_v10 = vld [vmem:[%s4268_s7 + $0x230] ss:$28 sps:$4 sm:$0xff]   ;;  %v3145_v12 = vld [vmem:[%s4268_s7 + $0x238] ss:$28 sps:$4 sm:$0xff]  }
 0x11b   : > { %v1076_v23 = vpop.f32.mrf.mxu1  ;;  %v1034_v32 = vadd.f32 %v1033_v27, %v496_v19  ;;  %v1075_v35 = vadd.f32 %v1074_v18, %v1032_v28  ;;  %v3088_v18 = vld [vmem:[%s4268_s7 + $0xa8] ss:$28 sps:$4 sm:$0xff]   ;;  %v3096_v19 = vld [vmem:[%s4268_s7 + $0x74] ss:$28 sps:$4 sm:$0xff]   ;;  %v3150_v13 = vld [vmem:[%s4268_s7 + $0x1fc] ss:$28 sps:$4 sm:$0xff]  }
 0x11c   : > { %v3112_v27 = vld [vmem:[%s4268_s7 + $0x348] ss:$28 sps:$4 sm:$0xff]   ;;  %v3120_v28 = vld [vmem:[%s4268_s7 + $0x314] ss:$28 sps:$4 sm:$0xff]  }
 0x11d   : > { %v1156_v24 = vpop.f32.mrf.mxu1  ;;  %v1077_v40 = vadd.f32 %v1076_v23, %v1034_v32  ;;  %2255 = vmatpush1.bf16.msra.mxu0 %v3082_v15  ;;  %v3100_v23 = vld [vmem:[%s4268_s7 + $0x38] ss:$28 sps:$4 sm:$0xff]   ;;  %v3132_v32 = vld [vmem:[%s4268_s7 + $0x2a4] ss:$28 sps:$4 sm:$0xff]  }
 0x11e   : > { %2256 = vmatprep.subr.bf16.mxu0 %v3090_v17  ;;  %v3153_v15 = vld [vmem:[%s4268_s7 + $0x204] ss:$28 sps:$4 sm:$0xff]   ;;  %v3148_v17 = vld [vmem:[%s4268_s7 + $0x1f8] ss:$28 sps:$4 sm:$0xff]  }
 0x11f   : > { %v1158_v29 = vpop.f32.mrf.mxu1 }
 0x121   : > { %v1160_v38 = vpop.f32.mrf.mxu1  ;;  %2257 = vmatpush1.bf16.msra.mxu0 %v3088_v18  ;;  %v3151_v18 = vld [vmem:[%s4268_s7 + $0x200] ss:$28 sps:$4 sm:$0xff]  }
 0x122   : > { %2258 = vmatprep.subr.bf16.mxu0 %v3096_v19  ;;  %v3156_v19 = vld [vmem:[%s4268_s7 + $0x1c4] ss:$28 sps:$4 sm:$0xff]  }
 0x123   : > { %v1162_v47 = vpop.f32.mrf.mxu1 }
 0x125   : > { %2259 = vmatpush1.bf16.msra.mxu0 %v3094_v20  ;;  %v3159_v20 = vld [vmem:[%s4268_s7 + $0x1cc] ss:$28 sps:$4 sm:$0xff]  }
 0x126   : > { %2260 = vmatprep.subr.bf16.mxu0 %v3102_v22  ;;  %v3154_v22 = vld [vmem:[%s4268_s7 + $0x1c0] ss:$28 sps:$4 sm:$0xff]  }
 0x129   : > { %2261 = vmatpush1.bf16.msra.mxu0 %v3100_v23  ;;  %v3157_v23 = vld [vmem:[%s4268_s7 + $0x1c8] ss:$28 sps:$4 sm:$0xff]  }
 0x154   : > { %v1113_v30 = vpop.f32.mrf.mxu0 }
 0x155   : > { %v1114_v37 = vadd.f32 %v1113_v30, %v1071_v33  ;;  %v3126_v30 = vld [vmem:[%s4268_s7 + $0x2dc] ss:$28 sps:$4 sm:$0xff]  }
 0x156   : > { %v1115_v34 = vpop.f32.mrf.mxu0  ;;  %v3130_v33 = vld [vmem:[%s4268_s7 + $0x2a0] ss:$28 sps:$4 sm:$0xff]  }
 0x157   : > { %v1116_v36 = vadd.f32 %v1115_v34, %v1073_v31  ;;  %v1157_v46 = vadd.f32 %v1156_v24, %v1114_v37  ;;  %v3108_v24 = vld [vmem:[%s4268_s7 + $0x4] ss:$28 sps:$4 sm:$0xff]   ;;  %v3124_v31 = vld [vmem:[%s4268_s7 + $0x2d8] ss:$28 sps:$4 sm:$0xff]   ;;  %v3138_v34 = vld [vmem:[%s4268_s7 + $0x26c] ss:$28 sps:$4 sm:$0xff]  }
 0x158   : > { %v1117_v39 = vpop.f32.mrf.mxu0  ;;  %2262 = vmatprep.subr.bf16.mxu0 %v3108_v24  ;;  %v3162_v24 = vld [vmem:[%s4268_s7 + $0x19c] ss:$28 sps:$4 sm:$0xff]  }
 0x159   : > { %v1118_v41 = vadd.f32 %v1117_v39, %v1075_v35  ;;  %v1159_v43 = vadd.f32 %v1158_v29, %v1116_v36  ;;  %v1165_v52 = vmax.f32 %v1157_v46, 0.0  ;;  %2263 = vmatpush1.bf16.msra.mxu0 %v3106_v25  ;;  %v3118_v29 = vld [vmem:[%s4268_s7 + $0x310] ss:$28 sps:$4 sm:$0xff]   ;;  %v3136_v35 = vld [vmem:[%s4268_s7 + $0x268] ss:$28 sps:$4 sm:$0xff]  }
 0x15a   : > { %v1119_v42 = vpop.f32.mrf.mxu0  ;;  %2264 = vmatprep.subr.bf16.mxu0 %v3114_v26  ;;  %v2635_v39 = vld [vmem:[%s4265_s4] ss:$0 sm:$0xff] }
 0x15b   : > { %v1161_v44 = vadd.f32 %v1160_v38, %v1118_v41  ;;  %v1120_v45 = vadd.f32 %v1119_v42, %v1077_v40  ;;  %v1166_v50 = vmax.f32 %v1159_v43, 0.0  ;;  %v3163_v25 = vld [vmem:[%s4268_s7 + $0x360] ss:$28 sps:$4 sm:$0xff]  }
 0x15c   : > { %v1366_v26 = vld [vmem:[%s4267_s6] sm:$0x3] }
 0x15d   : > { %v1163_v48 = vadd.f32 %v1162_v47, %v1120_v45  ;;  %v1167_v49 = vmax.f32 %v1161_v44, 0.0  ;;  %2265 = vmatpush2.bf16.msra.mxu0 %v3112_v27  ;;  %v3067_v47 = vld [vmem:[%s4268_s7 + $0x190] ss:$28 sps:$4 sm:$0xff]  }
 0x15e   : > { %2266 = vmatprep.subr.bf16.mxu0 %v3120_v28  ;;  %v1375_v28 = vrot.slane %v1366_v26, %v3762_v14 }
 0x15f   : > { %v1168_v51 = vmax.f32 %v1163_v48, 0.0  ;;  %v1169_v55 = vpack.c.bf16 %v1167_v49, %v1165_v52  ;;  %v3075_v49 = vld [vmem:[%s4268_s7 + $0x15c] ss:$28 sps:$4 sm:$0xff]  }
 0x160   : > { %v3079_v52 = vld [vmem:[%s4268_s7 + $0x120] ss:$28 sps:$4 sm:$0xff]  }
 0x161   : > { %v1170_v53 = vpack.c.bf16 %v1168_v51, %v1166_v50  ;;  %2267 = vmatpush2.bf16.msra.mxu0 %v3118_v29  ;;  %v3073_v50 = vld [vmem:[%s4268_s7 + $0x158] ss:$28 sps:$4 sm:$0xff]   ;;  %v3081_v51 = vld [vmem:[%s4268_s7 + $0x124] ss:$28 sps:$4 sm:$0xff]   ;;  %v1371_v29 = vrot.slane %v1366_v26, %v3768_v16 }
 0x162   : > { %2268 = vmatprep.subr.bf16.mxu0 %v3126_v30  ;;  %v3223_v26 = vld [vmem:[%s4268_s7 + $0x1d4] ss:$28 sps:$4 sm:$0xff]  }
 0x163   : > { %1338 = vmatprep.mubr.bf16.mxu1 %v1170_v53  ;;  %v3087_v53 = vld [vmem:[%s4268_s7 + $0xec] ss:$28 sps:$4 sm:$0xff]  }
 0x164   : > { %1339 = vmatmul.mubr.bf16.vlgmr.msra.gmra.mxu1 %v1169_v55  ;;  %v3093_v55 = vld [vmem:[%s4268_s7 + $0xb4] ss:$28 sps:$4 sm:$0xff]  }
 0x165   : > { %1459 = vmatpush1.bf16.msra.mxu1 %v3040_v54  ;;  %1490 = vmatprep.mubr.bf16.mxu1 %v3286_v21  ;;  %v3049_v21 = vld [vmem:[%s4266_s5 + $0x40] ss:$8 sps:$4 sm:$0xff]  }
 0x166   : > { %1460 = vmatprep.subr.bf16.mxu1 %v3045_v56  ;;  %2269 = vmatpush2.bf16.msra.mxu0 %v3124_v31  ;;  %v3085_v54 = vld [vmem:[%s4268_s7 + $0xe8] ss:$28 sps:$4 sm:$0xff]   ;;  %v3091_v56 = vld [vmem:[%s4268_s7 + $0xb0] ss:$28 sps:$4 sm:$0xff]  }
 0x167   : > { %2270 = vmatprep.subr.bf16.mxu0 %v3132_v32 }
 0x169   : > { %1461 = vmatpush1.bf16.msra.mxu1 %v3043_v57  ;;  %v3099_v57 = vld [vmem:[%s4268_s7 + $0x7c] ss:$28 sps:$4 sm:$0xff]  }
 0x16a   : > { %1462 = vmatprep.subr.bf16.mxu1 %v3048_v58  ;;  %2271 = vmatpush2.bf16.msra.mxu0 %v3130_v33  ;;  %v3097_v58 = vld [vmem:[%s4268_s7 + $0x78] ss:$28 sps:$4 sm:$0xff]  }
 0x16b   : > { %2272 = vmatprep.subr.bf16.mxu0 %v3138_v34 }
 0x16d   : > { %1463 = vmatpush1.bf16.msra.mxu1 %v3046_v59  ;;  %v3105_v59 = vld [vmem:[%s4268_s7 + $0x44] ss:$28 sps:$4 sm:$0xff]  }
 0x16e   : > { %1464 = vmatprep.subr.bf16.mxu1 %v3051_v60  ;;  %2273 = vmatpush2.bf16.msra.mxu0 %v3136_v35  ;;  %v3103_v60 = vld [vmem:[%s4268_s7 + $0x40] ss:$28 sps:$4 sm:$0xff]  }
 0x16f   : > { %2274 = vmatprep.subr.bf16.mxu0 %v3144_v8  ;;  %v3202_v8 = vld [vmem:[%s4268_s7 + $0x35c] ss:$28 sps:$4 sm:$0xff]  }
 0x171   : > { %1465 = vmatpush1.bf16.msra.mxu1 %v3049_v21  ;;  %v3111_v21 = vld [vmem:[%s4268_s7 + $0xc] ss:$28 sps:$4 sm:$0xff]  }
 0x172   : > { %1466 = vmatprep.subr.bf16.mxu1 %v3054_v61  ;;  %v3109_v61 = vld [vmem:[%s4268_s7 + $0x8] ss:$28 sps:$4 sm:$0xff]   ;;  %2275 = vmatpush2.bf16.msra.mxu0 %v3142_v10 }
 0x173   : > { %2276 = vmatprep.subr.bf16.mxu0 %v3150_v13  ;;  %v3205_v10 = vld [vmem:[%s4268_s7 + $0x324] ss:$28 sps:$4 sm:$0xff]   ;;  %v3208_v13 = vld [vmem:[%s4268_s7 + $0x2ec] ss:$28 sps:$4 sm:$0xff]  }
 0x175   : > { %1467 = vmatpush1.bf16.msra.mxu1 %v3052_v62  ;;  %v3117_v62 = vld [vmem:[%s4268_s7 + $0x354] ss:$28 sps:$4 sm:$0xff]  }
 0x176   : > { %1468 = vmatprep.subr.bf16.mxu1 %v3057_v63  ;;  %v3115_v63 = vld [vmem:[%s4268_s7 + $0x350] ss:$28 sps:$4 sm:$0xff]   ;;  %2277 = vmatpush2.bf16.msra.mxu0 %v3148_v17 }
 0x177   : > { %2278 = vmatprep.subr.bf16.mxu0 %v3156_v19  ;;  %v3211_v17 = vld [vmem:[%s4268_s7 + $0x2b4] ss:$28 sps:$4 sm:$0xff]   ;;  %v3214_v19 = vld [vmem:[%s4268_s7 + $0x27c] ss:$28 sps:$4 sm:$0xff]  }
 0x179   : > { %1469 = vmatpush1.bf16.msra.mxu1 %v3055_v0  ;;  %v3123_v0 = vld [vmem:[%s4268_s7 + $0x31c] ss:$28 sps:$4 sm:$0xff]  }
 0x17a   : > { %1470 = vmatprep.subr.bf16.mxu1 %v3060_v1  ;;  %v3121_v1 = vld [vmem:[%s4268_s7 + $0x318] ss:$28 sps:$4 sm:$0xff]   ;;  %2279 = vmatpush2.bf16.msra.mxu0 %v3154_v22  ;;  %v3217_v22 = vld [vmem:[%s4268_s7 + $0x244] ss:$28 sps:$4 sm:$0xff]  }
 0x17b   : > { %2334 = vmatprep.subr.bf16.mxu0 %v3162_v24  ;;  %v3220_v24 = vld [vmem:[%s4268_s7 + $0x20c] ss:$28 sps:$4 sm:$0xff]  }
 0x17d   : > { %1471 = vmatpush1.bf16.msra.mxu1 %v3058_v2  ;;  %v3129_v2 = vld [vmem:[%s4268_s7 + $0x2e4] ss:$28 sps:$4 sm:$0xff]  }
 0x17e   : > { %1472 = vmatprep.subr.bf16.mxu1 %v3063_v3  ;;  %v3127_v3 = vld [vmem:[%s4268_s7 + $0x2e0] ss:$28 sps:$4 sm:$0xff]  }
 0x181   : > { %1473 = vmatpush1.bf16.msra.mxu1 %v3061_v4  ;;  %v3135_v4 = vld [vmem:[%s4268_s7 + $0x2ac] ss:$28 sps:$4 sm:$0xff]  }
 0x182   : > { %2291 = vmatprep.subr.bf16.mxu1 %v3069_v7  ;;  %v3139_v7 = vld [vmem:[%s4268_s7 + $0x270] ss:$28 sps:$4 sm:$0xff]  }
 0x224   : > { %v2805_v36 = vpop.f32.mrf.mxu1 }
 0x226   : > { %v2806_v37 = vpop.f32.mrf.mxu1 }
 0x227   : > { %v2807_v38 = vadd.f32 %v2806_v37, %v2805_v36 }
 0x228   : > { %v2808_v40 = vpop.f32.mrf.mxu1 }
 0x229   : > { %v1341_v42 = vadd.f32 %v2807_v38, %v2635_v39 }
 0x22a   : > { %v2809_v41 = vpop.f32.mrf.mxu1 }
 0x22b   : > { %v2810_v43 = vadd.f32 %v2809_v41, %v2808_v40  ;;  %v1347_v45 = vmax.f32 %v1341_v42, 0.0  ;;  %v3160_v42 = vld [vmem:[%s4268_s7 + $0x198] ss:$28 sps:$4 sm:$0xff]  }
 0x22d   : > { %v1344_v44 = vadd.f32 %v2810_v43, %v2635_v39  ;;  %v3164_v43 = vld [vmem:[%s4268_s7 + $0x1a0] ss:$28 sps:$4 sm:$0xff]  }
 0x22f   : > { %v1348_v46 = vmax.f32 %v1344_v44, 0.0 }
 0x231   : > { %v1349_v48 = vpack.c.bf16 %v1348_v46, %v1347_v45  ;;  %v3167_v45 = vld [vmem:[%s4268_s7 + $0x164] ss:$28 sps:$4 sm:$0xff]  }
 0x232   : > { %v3168_v46 = vld [vmem:[%s4268_s7 + $0x328] ss:$28 sps:$4 sm:$0xff]  }
 0x233   : > { %1491 = vmatmul.mubr.bf16.vlgmr.msra.gmra.mxu1 %v1349_v48  ;;  %v3169_v48 = vld [vmem:[%s4268_s7 + $0x168] ss:$28 sps:$4 sm:$0xff]  }
 0x234   : > { %2292 = vmatpush1.bf16.msra.mxu1 %v3067_v47  ;;  %v3165_v47 = vld [vmem:[%s4268_s7 + $0x160] ss:$28 sps:$4 sm:$0xff]  }
 0x235   : > { %2293 = vmatprep.subr.bf16.mxu1 %v3075_v49  ;;  %v3172_v49 = vld [vmem:[%s4268_s7 + $0x12c] ss:$28 sps:$4 sm:$0xff]  }
 0x238   : > { %2294 = vmatpush1.bf16.msra.mxu1 %v3073_v50  ;;  %v3173_v50 = vld [vmem:[%s4268_s7 + $0x2f0] ss:$28 sps:$4 sm:$0xff]  }
 0x239   : > { %2295 = vmatprep.subr.bf16.mxu1 %v3081_v51  ;;  %v3170_v51 = vld [vmem:[%s4268_s7 + $0x128] ss:$28 sps:$4 sm:$0xff]  }
 0x23c   : > { %2296 = vmatpush1.bf16.msra.mxu1 %v3079_v52  ;;  %v3174_v52 = vld [vmem:[%s4268_s7 + $0x130] ss:$28 sps:$4 sm:$0xff]  }
 0x23d   : > { %2297 = vmatprep.subr.bf16.mxu1 %v3087_v53  ;;  %v3177_v53 = vld [vmem:[%s4268_s7 + $0xf4] ss:$28 sps:$4 sm:$0xff]  }
 0x240   : > { %2298 = vmatpush1.bf16.msra.mxu1 %v3085_v54  ;;  %v3178_v54 = vld [vmem:[%s4268_s7 + $0x2b8] ss:$28 sps:$4 sm:$0xff]  }
 0x241   : > { %2299 = vmatprep.subr.bf16.mxu1 %v3093_v55  ;;  %v3175_v55 = vld [vmem:[%s4268_s7 + $0xf0] ss:$28 sps:$4 sm:$0xff]  }
 0x244   : > { %2300 = vmatpush1.bf16.msra.mxu1 %v3091_v56  ;;  %v3179_v56 = vld [vmem:[%s4268_s7 + $0xf8] ss:$28 sps:$4 sm:$0xff]  }
 0x245   : > { %2301 = vmatprep.subr.bf16.mxu1 %v3099_v57  ;;  %v3182_v57 = vld [vmem:[%s4268_s7 + $0xbc] ss:$28 sps:$4 sm:$0xff]  }
 0x248   : > { %2302 = vmatpush1.bf16.msra.mxu1 %v3097_v58  ;;  %v3183_v58 = vld [vmem:[%s4268_s7 + $0x280] ss:$28 sps:$4 sm:$0xff]  }
 0x249   : > { %2303 = vmatprep.subr.bf16.mxu1 %v3105_v59  ;;  %v3180_v59 = vld [vmem:[%s4268_s7 + $0xb8] ss:$28 sps:$4 sm:$0xff]  }
 0x24c   : > { %2304 = vmatpush1.bf16.msra.mxu1 %v3103_v60  ;;  %v3184_v60 = vld [vmem:[%s4268_s7 + $0xc0] ss:$28 sps:$4 sm:$0xff]  }
 0x24d   : > { %2305 = vmatprep.subr.bf16.mxu1 %v3111_v21  ;;  %v3187_v21 = vld [vmem:[%s4268_s7 + $0x84] ss:$28 sps:$4 sm:$0xff]  }
 0x250   : > { %2306 = vmatpush1.bf16.msra.mxu1 %v3109_v61  ;;  %v3188_v61 = vld [vmem:[%s4268_s7 + $0x248] ss:$28 sps:$4 sm:$0xff]  }
 0x251   : > { %2307 = vmatprep.subr.bf16.mxu1 %v3117_v62  ;;  %v3185_v62 = vld [vmem:[%s4268_s7 + $0x80] ss:$28 sps:$4 sm:$0xff]  }
 0x254   : > { %2308 = vmatpush2.bf16.msra.mxu1 %v3115_v63  ;;  %v3189_v63 = vld [vmem:[%s4268_s7 + $0x88] ss:$28 sps:$4 sm:$0xff]  }
 0x255   : > { %2309 = vmatprep.subr.bf16.mxu1 %v3123_v0  ;;  %v3192_v0 = vld [vmem:[%s4268_s7 + $0x4c] ss:$28 sps:$4 sm:$0xff]  }
 0x258   : > { %2310 = vmatpush2.bf16.msra.mxu1 %v3121_v1  ;;  %v3193_v1 = vld [vmem:[%s4268_s7 + $0x210] ss:$28 sps:$4 sm:$0xff]  }
 0x259   : > { %2311 = vmatprep.subr.bf16.mxu1 %v3129_v2  ;;  %v3190_v2 = vld [vmem:[%s4268_s7 + $0x48] ss:$28 sps:$4 sm:$0xff]  }
 0x25c   : > { %2312 = vmatpush2.bf16.msra.mxu1 %v3127_v3  ;;  %v3194_v3 = vld [vmem:[%s4268_s7 + $0x50] ss:$28 sps:$4 sm:$0xff]  }
 0x25d   : > { %2313 = vmatprep.subr.bf16.mxu1 %v3135_v4  ;;  %v3197_v4 = vld [vmem:[%s4268_s7 + $0x14] ss:$28 sps:$4 sm:$0xff]  }
 0x260   : > { %2314 = vmatpush2.bf16.msra.mxu1 %v3133_v5  ;;  %v3198_v5 = vld [vmem:[%s4268_s7 + $0x1d8] ss:$28 sps:$4 sm:$0xff]  }
 0x261   : > { %2315 = vmatprep.subr.bf16.mxu1 %v3141_v6  ;;  %v3195_v6 = vld [vmem:[%s4268_s7 + $0x10] ss:$28 sps:$4 sm:$0xff]  }
 0x264   : > { %2316 = vmatpush2.bf16.msra.mxu1 %v3139_v7  ;;  %v3199_v7 = vld [vmem:[%s4268_s7 + $0x18] ss:$28 sps:$4 sm:$0xff]  }
 0x265   : > { %2317 = vmatprep.subr.bf16.mxu1 %v3147_v9  ;;  %v3200_v9 = vld [vmem:[%s4268_s7 + $0x358] ss:$28 sps:$4 sm:$0xff]  }
 0x268   : > { %2318 = vmatpush2.bf16.msra.mxu1 %v3145_v12  ;;  %v3203_v12 = vld [vmem:[%s4268_s7 + $0x320] ss:$28 sps:$4 sm:$0xff]  }
 0x269   : > { %2319 = vmatprep.subr.bf16.mxu1 %v3153_v15  ;;  %v3206_v15 = vld [vmem:[%s4268_s7 + $0x2e8] ss:$28 sps:$4 sm:$0xff]  }
 0x26c   : > { %2320 = vmatpush2.bf16.msra.mxu1 %v3151_v18  ;;  %v3209_v18 = vld [vmem:[%s4268_s7 + $0x2b0] ss:$28 sps:$4 sm:$0xff]  }
 0x26d   : > { %2321 = vmatprep.subr.bf16.mxu1 %v3159_v20  ;;  %v3212_v20 = vld [vmem:[%s4268_s7 + $0x278] ss:$28 sps:$4 sm:$0xff]  }
 0x270   : > { %2322 = vmatpush2.bf16.msra.mxu1 %v3157_v23  ;;  %v3215_v23 = vld [vmem:[%s4268_s7 + $0x240] ss:$28 sps:$4 sm:$0xff]  }
 0x271   : > { %2811 = vmatprep.subr.bf16.mxu1 %v3163_v25  ;;  %v3218_v25 = vld [vmem:[%s4268_s7 + $0x208] ss:$28 sps:$4 sm:$0xff]  }
 0x2f3   : > { %v1492_v27 = vpop.f32.mrf.mxu1 }
 0x2f4   : > { %v1493_v34 = vadd.f32 %v1492_v27, %v1371_v29  ;;  %v3221_v27 = vld [vmem:[%s4268_s7 + $0x1d0] ss:$28 sps:$4 sm:$0xff]  }
 0x2f5   : > { %v1494_v30 = vpop.f32.mrf.mxu1 }
 0x2f6   : > { %v1495_v32 = vadd.f32 %v1494_v30, %v1375_v28  ;;  %v1501_v40 = vmax.f32 %v1493_v34, 0.0  ;;  %v1651_v30 = vsub.s32 3, %v3759_v11 }
 0x2f7   : > { %v1496_v31 = vpop.f32.mrf.mxu1 }
 0x2f8   : > { %v1497_v33 = vadd.f32 %v1496_v31, %v1371_v29  ;;  %v1502_v38 = vmax.f32 %v1495_v32, 0.0  ;;  %v1635_v29 = vld [vmem:[%s4269_s8] sm:$0x7f] }
 0x2f9   : > { %v1498_v35 = vpop.f32.mrf.mxu1  ;;  %v1640_v31 = vrot.slane %v1635_v29, %v3768_v16  ;;  %v1652_v34 = vrot.slane %v1635_v29, %v1651_v30 }
 0x2fa   : > { %v1499_v36 = vadd.f32 %v1498_v35, %v1375_v28  ;;  %v1503_v37 = vmax.f32 %v1497_v33, 0.0  ;;  %v1647_v28 = vsub.s32 2, %v3759_v11  ;;  %v1644_v33 = vrot.slane %v1635_v29, %v3762_v14 }
 0x2fc   : > { %v1504_v39 = vmax.f32 %v1499_v36, 0.0  ;;  %v4030_v44 = vpack.c.bf16 %v1503_v37, %v1501_v40  ;;  %v1648_v32 = vrot.slane %v1635_v29, %v1647_v28 }
 0x2fe   : > { %v1506_v41 = vpack.c.bf16 %v1504_v39, %v1502_v38 }
 0x300   : > { %2280 = vmatprep.mubr.bf16.mxu0 %v1506_v41  ;;  %2323 = vmatprep.mubr.bf16.mxu1 %v1506_v41 }
 0x301   : > { %2281 = vmatmul.mubr.bf16.vlgmr.msra.gmra.mxu0 %v4030_v44  ;;  %2324 = vmatmul.mubr.bf16.vlgmr.msra.gmra.mxu1 %v4030_v44 }
 0x302   : > { %2335 = vmatpush1.bf16.msra.mxu0 %v3160_v42  ;;  %2812 = vmatpush3.bf16.msra.mxu1 %v3164_v43 }
 0x303   : > { %2366 = vmatprep.mubr.bf16.mxu0 %v1506_v41  ;;  %2409 = vmatprep.mubr.bf16.mxu1 %v1506_v41 }
 0x304   : > { %2336 = vmatprep.subr.bf16.mxu0 %v3167_v45  ;;  %2813 = vmatprep.subr.bf16.mxu1 %v3168_v46 }
 0x306   : > { %2337 = vmatpush1.bf16.msra.mxu0 %v3165_v47  ;;  %2814 = vmatpush3.bf16.msra.mxu1 %v3169_v48 }
 0x307   : > { %2338 = vmatprep.subr.bf16.mxu0 %v3172_v49  ;;  %2815 = vmatprep.subr.bf16.mxu1 %v3173_v50 }
 0x30a   : > { %2339 = vmatpush1.bf16.msra.mxu0 %v3170_v51  ;;  %2816 = vmatpush3.bf16.msra.mxu1 %v3174_v52 }
 0x30b   : > { %2340 = vmatprep.subr.bf16.mxu0 %v3177_v53  ;;  %2817 = vmatprep.subr.bf16.mxu1 %v3178_v54 }
 0x30e   : > { %2341 = vmatpush1.bf16.msra.mxu0 %v3175_v55  ;;  %2818 = vmatpush3.bf16.msra.mxu1 %v3179_v56 }
 0x30f   : > { %2342 = vmatprep.subr.bf16.mxu0 %v3182_v57  ;;  %2819 = vmatprep.subr.bf16.mxu1 %v3183_v58  ;;  %v1663_v57 = vsub.s32 6, %v3759_v11 }
 0x312   : > { %2343 = vmatpush1.bf16.msra.mxu0 %v3180_v59  ;;  %2820 = vmatpush3.bf16.msra.mxu1 %v3184_v60  ;;  %v1664_v59 = vrot.slane %v1635_v29, %v1663_v57 }
 0x313   : > { %2344 = vmatprep.subr.bf16.mxu0 %v3187_v21  ;;  %2821 = vmatprep.subr.bf16.mxu1 %v3188_v61 }
 0x316   : > { %2345 = vmatpush1.bf16.msra.mxu0 %v3185_v62  ;;  %2822 = vmatpush3.bf16.msra.mxu1 %v3189_v63 }
 0x317   : > { %2346 = vmatprep.subr.bf16.mxu0 %v3192_v0  ;;  %2823 = vmatprep.subr.bf16.mxu1 %v3193_v1 }
 0x31a   : > { %2347 = vmatpush1.bf16.msra.mxu0 %v3190_v2  ;;  %2824 = vmatpush3.bf16.msra.mxu1 %v3194_v3 }
 0x31b   : > { %2348 = vmatprep.subr.bf16.mxu0 %v3197_v4  ;;  %2825 = vmatprep.subr.bf16.mxu1 %v3198_v5  ;;  %v1655_v4 = vsub.s32 4, %v3759_v11  ;;  %v1659_v5 = vsub.s32 5, %v3759_v11 }
 0x31e   : > { %2349 = vmatpush1.bf16.msra.mxu0 %v3195_v6  ;;  %2826 = vmatpush3.bf16.msra.mxu1 %v3199_v7  ;;  %v1656_v6 = vrot.slane %v1635_v29, %v1655_v4  ;;  %v1660_v7 = vrot.slane %v1635_v29, %v1659_v5 }
 0x31f   : > { %2350 = vmatprep.subr.bf16.mxu0 %v3202_v8 }
 0x321   : > { %2410 = vmatmul.mubr.bf16.vlgmr.msra.gmra.mxu1 %v4030_v44 }
 0x322   : > { %2351 = vmatpush2.bf16.msra.mxu0 %v3200_v9 }
 0x323   : > { %2352 = vmatprep.subr.bf16.mxu0 %v3205_v10 }
 0x326   : > { %2353 = vmatpush2.bf16.msra.mxu0 %v3203_v12 }
 0x327   : > { %2354 = vmatprep.subr.bf16.mxu0 %v3208_v13 }
 0x32a   : > { %2355 = vmatpush2.bf16.msra.mxu0 %v3206_v15 }
 0x32b   : > { %2356 = vmatprep.subr.bf16.mxu0 %v3211_v17 }
 0x32e   : > { %2357 = vmatpush2.bf16.msra.mxu0 %v3209_v18 }
 0x32f   : > { %2358 = vmatprep.subr.bf16.mxu0 %v3214_v19 }
 0x332   : > { %2359 = vmatpush2.bf16.msra.mxu0 %v3212_v20 }
 0x333   : > { %2360 = vmatprep.subr.bf16.mxu0 %v3217_v22 }
 0x336   : > { %2361 = vmatpush2.bf16.msra.mxu0 %v3215_v23 }
 0x337   : > { %2362 = vmatprep.subr.bf16.mxu0 %v3220_v24 }
 0x33a   : > { %2363 = vmatpush2.bf16.msra.mxu0 %v3218_v25 }
 0x33b   : > { %2364 = vmatprep.subr.bf16.mxu0 %v3223_v26 }
 0x33e   : > { %2365 = vmatpush2.bf16.msra.mxu0 %v3221_v27 }
 0x341   : > { %2367 = vmatmul.mubr.bf16.vlgmr.msra.gmra.mxu0 %v4030_v44 }
 0x3c1   : > { %v2282_v35 = vpop.f32.mrf.mxu0  ;;  %v2325_v36 = vpop.f32.mrf.mxu1 }
 0x3c2   : > { %v2283_v37 = vadd.f32 %v2282_v35, %v1640_v31  ;;  %v2326_v38 = vadd.f32 %v2325_v36, %v1648_v32 }
 0x3c3   : > { %v2284_v39 = vpop.f32.mrf.mxu0  ;;  %v2327_v40 = vpop.f32.mrf.mxu1 }
 0x3c4   : > { %v2418_v41 = vmax.f32 %v2283_v37, 0.0  ;;  %v2420_v42 = vmax.f32 %v2326_v38, 0.0  ;;  %v2285_v43 = vadd.f32 %v2284_v39, %v1644_v33  ;;  %v2328_v44 = vadd.f32 %v2327_v40, %v1652_v34 }
 0x3c5   : > { %v2286_v45 = vpop.f32.mrf.mxu0  ;;  %v2329_v46 = vpop.f32.mrf.mxu1 }
 0x3c6   : > { %2432 = vst [vmem:[%s4178_s23] sm:$0xff] %v2418_v41  ;;  %2434 = vst [vmem:[%s4178_s23 + $0x10] sm:$0xff] %v2420_v42  ;;  %v2419_v14 = vmax.f32 %v2285_v43, 0.0  ;;  %v2421_v16 = vmax.f32 %v2328_v44, 0.0  ;;  %v2287_v47 = vadd.f32 %v2286_v45, %v1640_v31  ;;  %v2330_v48 = vadd.f32 %v2329_v46, %v1648_v32 }
 0x3c7   : > { %v2288_v49 = vpop.f32.mrf.mxu0  ;;  %v2331_v50 = vpop.f32.mrf.mxu1 }
 0x3c8   : > { %2433 = vst [vmem:[%s4178_s23 + $0x8] sm:$0xff] %v2419_v14  ;;  %2435 = vst [vmem:[%s4178_s23 + $0x18] sm:$0xff] %v2421_v16  ;;  %v2425_v51 = vmax.f32 %v2287_v47, 0.0  ;;  %v2427_v52 = vmax.f32 %v2330_v48, 0.0  ;;  %v2289_v53 = vadd.f32 %v2288_v49, %v1644_v33  ;;  %v2332_v54 = vadd.f32 %v2331_v50, %v1652_v34 }
 0x3ca   : > { %2439 = vst [vmem:[%s4178_s23 + $0x38] sm:$0xff] %v2425_v51  ;;  %2441 = vst [vmem:[%s4178_s23 + $0x48] sm:$0xff] %v2427_v52  ;;  %v2426_v55 = vmax.f32 %v2289_v53, 0.0  ;;  %v2428_v56 = vmax.f32 %v2332_v54, 0.0 }
 0x3cc   : > { %2440 = vst [vmem:[%s4178_s23 + $0x40] sm:$0xff] %v2426_v55  ;;  %2442 = vst [vmem:[%s4178_s23 + $0x50] sm:$0xff] %v2428_v56 }
 0x3e1   : > { %v2827_v58 = vpop.f32.mrf.mxu1 }
 0x3e3   : > { %v2828_v60 = vpop.f32.mrf.mxu1 }
 0x3e4   : > { %v2829_v21 = vadd.f32 %v2828_v60, %v2827_v58 }
 0x3e5   : > { %v2830_v61 = vpop.f32.mrf.mxu1 }
 0x3e6   : > { %v2412_v62 = vadd.f32 %v2829_v21, %v1664_v59 }
 0x3e7   : > { %v2831_v63 = vpop.f32.mrf.mxu1 }
 0x3e8   : > { %v2424_v0 = vmax.f32 %v2412_v62, 0.0  ;;  %v2832_v1 = vadd.f32 %v2831_v63, %v2830_v61 }
 0x3ea   : > { %2438 = vst.msk [vmem:[%s4178_s23 + $0x30] sm:$0xff] %vm989_vm0, %v2424_v0  ;;  %v2415_v2 = vadd.f32 %v2832_v1, %v1664_v59 }
 0x3ec   : > { %v2431_v3 = vmax.f32 %v2415_v2, 0.0 }
 0x3ee   : > { %2445 = vst.msk [vmem:[%s4178_s23 + $0x68] sm:$0xff] %vm989_vm0, %v2431_v3 }
 0x401   : > { %v2368_v8 = vpop.f32.mrf.mxu0 }
 0x402   : > { %v2369_v9 = vadd.f32 %v2368_v8, %v1656_v6 }
 0x403   : > { %v2370_v10 = vpop.f32.mrf.mxu0 }
 0x404   : > { %v2422_v12 = vmax.f32 %v2369_v9, 0.0  ;;  %v2371_v13 = vadd.f32 %v2370_v10, %v1660_v7 }
 0x405   : > { %v2372_v15 = vpop.f32.mrf.mxu0 }
 0x406   : > { %2436 = vst [vmem:[%s4178_s23 + $0x20] sm:$0xff] %v2422_v12  ;;  %v2423_v17 = vmax.f32 %v2371_v13, 0.0  ;;  %v2373_v18 = vadd.f32 %v2372_v15, %v1656_v6 }
 0x407   : > { %v2374_v19 = vpop.f32.mrf.mxu0 }
 0x408   : > { %2437 = vst [vmem:[%s4178_s23 + $0x28] sm:$0xff] %v2423_v17  ;;  %v2429_v20 = vmax.f32 %v2373_v18, 0.0  ;;  %v2375_v22 = vadd.f32 %v2374_v19, %v1660_v7  ;;  %2453 = sbr.rel (!%p3378_p5) target bundleno = 1065 (0x429), region = 60 }
 0x40a   : > { %2443 = vst [vmem:[%s4178_s23 + $0x58] sm:$0xff] %v2429_v20  ;;  %v2430_v11 = vmax.f32 %v2375_v22, 0.0 }
 0x40c   : > { %2444 = vst [vmem:[%s4178_s23 + $0x60] sm:$0xff] %v2430_v11 }
 0x40d   : > { %s4278_s25 = smov (!%p2456_p11, %s2455_s25), 2 }
 0x40e   : > { %s4206_s26 = smul.u32 896, %s4278_s25 }
 0x410   : > { %s2461_s27 = ssub.s32 1792, %s4206_s26 }
 0x411   : > { %2462 = vsyncadd %s4201_s24, %s2461_s27  ;;  %p2783_p12 = scmp.ne.s32.totalorder %s4206_s26, 0  ;;  %s2835_s17 = smul.u32 1792, %s3361_s13 }
 0x412   : > { %s2468_s16 = sshll.u32 %s4178_s23, 4  ;;  %s3287_s14 = smov [#allocation2]   ;;  %s4218_s16 = int_to_ptr.vmem [resolvable:$true] %s2468_s16 }
 0x413   : > { %s4216_s21 = scalar_lea.hbm %s4270_s9, %s2835_s17  ;;  %s3224_s29 = scalar_lea.vmem %s4218_s16, %s4206_s26 }
 0x414   : > { %p3225_p13 = scmp.ne.s32.totalorder %s4218_s16, %s3224_s29  ;;  %s3228_s22 = sshll.u32 %s3287_s14, 4  ;;  %s3229_s22 = int_to_ptr.vmem [resolvable:$false] %s3228_s22 }
 0x415   : > { %s3230_s13 = scalar_lea.vmem %s3229_s22, 3584  ;;  %p3231_p2 = scmp.lt.s32.totalorder %s4218_s16, %s3229_s22 }
 0x416   : > { %p3226_p0 = pnand %p3225_p13, %p2783_p12  ;;  %p3232_p3 = scmp.lt.s32.totalorder %s3230_s13, %s3224_s29 }
 0x418   : > { %p3227_p1 = pneg %p3226_p0  ;;  %p3233_p4 = por %p3232_p3, %p3231_p2 }
 0x41a   : > { %p3234_p5 = pnand %p3233_p4, %p3227_p1 }
 0x41c   : > { %3237 = shalt.err (!%p3234_p5)
}
 0x41d   : > { %s3238_s23 = scalar_lea.hbm %s4216_s21, %s4206_s26  ;;  %s3242_s17 = scalar_lea.hbm %s4270_s9, 2688 }
 0x41e   : > { %p3239_p7 = scmp.ne.s32.totalorder %s4216_s21, %s3238_s23  ;;  %p3243_p10 = scmp.lt.s32.totalorder %s4216_s21, %s4270_s9 }
 0x41f   : > { %p3244_p11 = scmp.lt.s32.totalorder %s3242_s17, %s3238_s23 }
 0x420   : > { %p3240_p8 = pnand %p3239_p7, %p2783_p12 }
 0x421   : > { %p3245_p13 = por %p3244_p11, %p3243_p10 }
 0x422   : > { %p3241_p9 = pneg %p3240_p8 }
 0x424   : > { %p3246_p0 = pnand %p3245_p13, %p3241_p9 }
 0x426   : > { %3249 = shalt.err (!%p3246_p0)
}
 0x427   : > { %s3288_s29 = smov 896   ;;  %s3289_s14 = smov 56  }
 0x428   : > { %2474 = dma.vmem_to_hbm [thread:$0]  (%p2783_p12), %s4218_s16, %s4206_s26, %s4216_s21, %s4201_s24, %s3288_s29, %s3288_s29, %s3289_s14  }
 0x429 PF: > { %p2841_p1 = scmp.ge.s32.totalorder %s3284_s12, 2  ;;  %s2483_s22 = sand.u32 1, %s3272_s30  }
 0x42a   : > { %s2484_s13 = scalar_lea.sflag [#allocation3], %s2483_s22 }
 0x42b   : > { %p2838_p2 = pnand %p2841_p1, %p3382_p6 }
 0x42d   : > { %p2839_p3 = pneg %p2838_p2 }
 0x42f   : > { %3267 = dma.done.wait (%p2839_p3), %s2484_s13, 1792  }
 0x430   : > { %3269 = vsyncadd (%p2839_p3), %s2484_s13, 4294965504  ;;  %p19_p4 = scmp.ge.s32.totalorder %s3365_s15, 4   ;;  %s4273_s30 = smov %s3276_s10 }
 0x431   : > { %s4274_s10 = smov %s3280_s11  ;;  %s4275_s11 = smov %s3376_s18 }
 0x432   : > { %s4276_s12 = smov %s3365_s15  ;;  %21 = sbr.rel (!%p19_p4) target bundleno = 3 (0x3), region = 91 }
 0x437   :  { %2489 = vsyncpa [#allocation3], 1 }
 0x438   :  { %2491 = vsyncpa [#allocation3 + $0x1], 1 }

</bundles_post_ra>
